<compile_context>
chip_gen: v7x
topology: tpu7x:2x2x1
jax: 0.10.0
libtpu: 0.0.40
codegen_flags: <defaults>
</compile_context>

<pallas_src>
import math

import jax
import jax.numpy as jnp
from jax.experimental import pallas as pl
from jax.experimental.pallas import tpu as pltpu


def _lambda_silu_kernel(x_ref, o_ref):
    # Elementwise op of the Lambda layer: op(x) = x * sigmoid(x) (SiLU).
    x = x_ref[...]
    # f32 compute path (no-op cast for f32 inputs).
    # TODO(synk): a bf16-native path on v6e/v7x would skip this upcast; kept
    # f32 unconditionally for v5e portability (no bf16 VPU/EUP there).
    xf = x if x.dtype == jnp.float32 else x.astype(jnp.float32)
    sig = 1.0 / (1.0 + jnp.exp(-xf))        # exact; exp on EUP, divide hidden
    o_ref[...] = (xf * sig).astype(o_ref.dtype)


def lambda_forward(x: jax.Array) -> jax.Array:
    """Apply the Lambda layer's op (SiLU) to an arbitrary-shape tensor."""
    orig_shape = x.shape
    total = int(math.prod(orig_shape))
    itemsize = jnp.dtype(x.dtype).itemsize

    # Sublane packing per dtype: 8 for 4-byte, 16 for 2-byte, 32 for 1-byte.
    sub = max(8, 32 // itemsize)
    tile_bytes = 4 * 1024 * 1024  # ~4 MiB/block; x2 (in+out) x2 (dbl-buffer)

    compiler_params = pltpu.CompilerParams(
        dimension_semantics=("parallel",),
        vmem_limit_bytes=32 * 1024 * 1024,
    )
    cost = pl.CostEstimate(
        flops=4 * total,
        transcendentals=total,
        bytes_accessed=2 * total * itemsize,
    )

    # Prefer a lane-dense 2-D slab (rows, lane_w) with lane_w a multiple of
    # 128 that divides the element count exactly -> pure view, no pad, and
    # unmasked full-lane stores.  Prefer widths that still give >= `sub` rows
    # so sublanes of each vreg are fully used.
    lane_w = None
    for cand in (2048, 1024, 512, 256, 128):
        if total % cand == 0 and total // cand >= sub:
            lane_w = cand
            break
    if lane_w is None:
        for cand in (2048, 1024, 512, 256, 128):
            if total % cand == 0:
                lane_w = cand
                break

    if lane_w is not None:
        rows = total // lane_w
        x2d = x.reshape(rows, lane_w)

        tile_rows = max(1, tile_bytes // (lane_w * itemsize))
        tile_rows = min(tile_rows, rows)
        if tile_rows < rows:
            # Partial-coverage blocks need dtype-packed sublane alignment;
            # full-dim blocks (tile_rows == rows) are exempt.
            tile_rows = max(sub, (tile_rows // sub) * sub)
        if rows > sub:
            # Ensure >= 2 grid blocks so the "parallel" axis can be sharded
            # across v7x's two TensorCores (keeps alignment to `sub`).
            half = pl.cdiv(pl.cdiv(rows, 2), sub) * sub
            tile_rows = min(tile_rows, half)

        grid = (pl.cdiv(rows, tile_rows),)
        out2d = pl.pallas_call(
            _lambda_silu_kernel,
            out_shape=jax.ShapeDtypeStruct((rows, lane_w), x.dtype),
            grid_spec=pl.GridSpec(
                grid=grid,
                in_specs=[pl.BlockSpec((tile_rows, lane_w), lambda i: (i, 0))],
                out_specs=pl.BlockSpec((tile_rows, lane_w), lambda i: (i, 0)),
            ),
            compiler_params=compiler_params,
            cost_estimate=cost,
        )(x2d)
        return out2d.reshape(orig_shape)

    # Element count not divisible by 128: run directly on the flat buffer
    # (no pad / slice round trip).  The ragged last block is handled by
    # Pallas' masked writeback; small tensors use a single full-array block.
    x1d = x.reshape(total)
    tile_len = max(1024, (tile_bytes // itemsize) // 1024 * 1024)
    if tile_len >= total:
        tile_len = total  # single full-dim block (exempt from 128 rule)
    grid = (pl.cdiv(total, tile_len),)
    out1d = pl.pallas_call(
        _lambda_silu_kernel,
        out_shape=jax.ShapeDtypeStruct((total,), x.dtype),
        grid_spec=pl.GridSpec(
            grid=grid,
            in_specs=[pl.BlockSpec((tile_len,), lambda i: (i,))],
            out_specs=pl.BlockSpec((tile_len,), lambda i: (i,)),
        ),
        compiler_params=compiler_params,
        cost_estimate=cost,
    )(x1d)
    return out1d.reshape(orig_shape)


# TODO(synk): Lambda accepts an arbitrary Python callable `op`; only this
# concrete elementwise instantiation (SiLU) is compiled into the kernel.
# TODO(synk): input_output_aliases={0: 0} would halve the HBM footprint, but
# donates the caller's buffer; left out so `x` stays valid after the call.


if __name__ == "__main__":
    key = jax.random.PRNGKey(0)
    k0, k1 = jax.random.split(key)

    # Primary shape (NCHW), element count divisible by 128 -> 2-D slab path.
    x = jax.random.normal(k0, (2, 4, 16, 16), dtype=jnp.float32)
    y = lambda_forward(x)
    jax.block_until_ready(y)
    y_ref = x * jax.nn.sigmoid(x)
    assert y.shape == x.shape and y.dtype == x.dtype
    assert jnp.allclose(y, y_ref, atol=1e-5, rtol=1e-5)

    # Ragged shape (7x7 spatial, 294 elements) -> flat no-pad path.
    x2 = jax.random.normal(k1, (2, 3, 7, 7), dtype=jnp.float32)
    y2 = lambda_forward(x2)
    jax.block_until_ready(y2)
    y2_ref = x2 * jax.nn.sigmoid(x2)
    assert y2.shape == x2.shape and y2.dtype == x2.dtype
    assert jnp.allclose(y2, y2_ref, atol=1e-5, rtol=1e-5)

    print("KERNEL_OK")
</pallas_src>

<mosaic_0001>
module attributes {stable_mosaic.version = 11 : i64} {
  func.func @_lambda_silu_kernel(%arg0: i32, %arg1: memref<8x256xf32, #tpu.memory_space<vmem>>, %arg2: memref<8x256xf32, #tpu.memory_space<vmem>>) attributes {dimension_semantics = [#tpu.dimension_semantics<parallel>], iteration_bounds = array<i64: 1>, scalar_prefetch = 0 : i64, scratch_operands = 0 : i64, tpu.core_type = #tpu.core_type<tc>, window_params = [{transform_indices = @transform_0, window_bounds = array<i64: 8, 256>}, {transform_indices = @transform_1, window_bounds = array<i64: 8, 256>}]} {
    %c0 = arith.constant 0 : index
    %c0_0 = arith.constant 0 : index
    %0 = vector.load %arg1[%c0, %c0_0] : memref<8x256xf32, #tpu.memory_space<vmem>>, vector<8x256xf32>
    %cst = arith.constant 0.000000e+00 : f32
    %1 = vector.broadcast %cst : f32 to vector<8x256xf32>
    %2 = arith.subf %1, %0 : vector<8x256xf32>
    %3 = math.exp %2 : vector<8x256xf32>
    %cst_1 = arith.constant 1.000000e+00 : f32
    %4 = vector.broadcast %cst_1 : f32 to vector<8x256xf32>
    %5 = arith.addf %4, %3 : vector<8x256xf32>
    %cst_2 = arith.constant 1.000000e+00 : f32
    %6 = vector.broadcast %cst_2 : f32 to vector<8x256xf32>
    %7 = arith.divf %6, %5 : vector<8x256xf32>
    %8 = arith.mulf %0, %7 : vector<8x256xf32>
    %c0_3 = arith.constant 0 : index
    %c0_4 = arith.constant 0 : index
    %9 = vector.load %arg2[%c0_3, %c0_4] : memref<8x256xf32, #tpu.memory_space<vmem>>, vector<8x256xf32>
    tpu.vector_store %arg2[%c0_3, %c0_4], %8 {strides = array<i32>} : memref<8x256xf32, #tpu.memory_space<vmem>>, vector<8x256xf32>,
    return
  }
  func.func @transform_0(%arg0: i32) -> (i32, i32) {
    %c0_i32 = arith.constant 0 : i32
    %c0_i32_0 = arith.constant 0 : i32
    return %arg0, %c0_i32 : i32, i32
  }
  func.func @transform_1(%arg0: i32) -> (i32, i32) {
    %c0_i32 = arith.constant 0 : i32
    %c0_i32_0 = arith.constant 0 : i32
    return %arg0, %c0_i32 : i32, i32
  }
}

</mosaic_0001>

<bundles_post_ra>
// kernel: tpu_custom_call.1
= control target key start
LH: loop header
LB: loop body
LE: loop exit
PB: predicated region body
PF: predicated region fallthrough
CT: control target
= control target key end

     0   :  { %6 = vsyncpa [#allocation3], 0  ;;  %s148_s0 = inlined_call_operand.hbm [shape: f32[8,256], index: 0, kind: input, shape index: {}]   ;;  %s149_s1 = inlined_call_operand.hbm [shape: f32[8,256], index: 1, kind: output, shape index: {}]  }
   0x1   :  { %7 = vsyncpa [#allocation4], 0  ;;  %s112_s6 = smov [#allocation2]   ;;  %s64_s10 = scalar_lea.hbm %s148_s0, 256 }
   0x2   :  { %s14_s7 = sshll.u32 %s112_s6, 4  ;;  %p65_p0 = scmp.ne.s32.totalorder %s148_s0, %s64_s10  ;;  %s15_s7 = int_to_ptr.vmem [resolvable:$true] %s14_s7 }
   0x3   :  { %p68_p1 = scmp.lt.u32.totalorder %s64_s10, %s148_s0 }
   0x5   :  { %p70_p2 = pnand %p68_p1, %p65_p0 }
   0x7   :  { %73 = shalt.err (!%p70_p2)
}
   0x8   :  { %s74_s15 = scalar_lea.vmem %s15_s7, 256  ;;  %p79_p4 = scmp.lt.s32.totalorder %s15_s7, %s15_s7 }
   0x9   :  { %p75_p3 = scmp.ne.s32.totalorder %s15_s7, %s74_s15  ;;  %p80_p5 = scmp.lt.s32.totalorder %s74_s15, %s74_s15 }
   0xb   :  { %p81_p6 = por %p80_p5, %p79_p4 }
   0xd   :  { %p82_p7 = pnand %p81_p6, %p75_p3 }
   0xf   :  { %85 = shalt.err (!%p82_p7)
}
  0x10   :  { %17 = dma.hbm_to_vmem [thread:$0]  %s148_s0, 256, %s15_s7, [#allocation3]  }
  0x11   :  { %108 = dma.done.wait [#allocation3], 256  }
  0x12   :  { %109 = vsyncadd [#allocation3], 4294967040  ;;  %v21_v0 = vld [vmem:[#allocation2] sm:$0xff]  ;;  %v22_v1 = vld [vmem:[#allocation2 + $0x8] sm:$0xff]  ;;  %s113_s18 = smov [#allocation5]  }
  0x13   :  { %v23_v2 = vsub.f32 0.0, %v21_v0  ;;  %v24_v3 = vsub.f32 0.0, %v22_v1  ;;  %s45_s19 = sshll.u32 %s113_s18, 4  ;;  %s46_s19 = int_to_ptr.vmem [resolvable:$true] %s45_s19 }
  0x14   :  { %s86_s0 = scalar_lea.vmem %s46_s19, 256  ;;  %p91_p9 = scmp.lt.s32.totalorder %s46_s19, %s46_s19 }
  0x15   :  { %v25_v4 = vmul.f32 1.442695, %v23_v2  ;;  %v27_v5 = vmul.f32 1.442695, %v24_v3  ;;  %p87_p8 = scmp.ne.s32.totalorder %s46_s19, %s86_s0  ;;  %p92_p10 = scmp.lt.s32.totalorder %s86_s0, %s86_s0 }
  0x17   :  { %56 = vpow2.f32 %v25_v4  ;;  %p93_p11 = por %p92_p10, %p91_p9 }
  0x18   :  { %58 = vpow2.f32 %v27_v5 }
  0x19   :  { %p94_p12 = pnand %p93_p11, %p87_p8 }
  0x21   :  { %v57_v6 = vpop.eup %56 }
  0x22   :  { %v59_v7 = vpop.eup %58  ;;  %v29_v8 = vadd.f32 1.0, %v57_v6 }
  0x23   :  { %v30_v9 = vadd.f32 1.0, %v59_v7 }
  0x24   :  { %60 = vrcp.f32 %v29_v8 }
  0x25   :  { %62 = vrcp.f32 %v30_v9 }
  0x2e   :  { %v61_v10 = vpop.eup %60 }
  0x2f   :  { %v63_v11 = vpop.eup %62  ;;  %v35_v12 = vmul.f32 %v61_v10, %v21_v0 }
  0x30   :  { %v36_v13 = vmul.f32 %v63_v11, %v22_v1 }
  0x31   :  { %37 = vst [vmem:[#allocation5] sm:$0xff] %v35_v12 }
  0x32   :  { %38 = vst [vmem:[#allocation5 + $0x8] sm:$0xff] %v36_v13 }
  0x33   :  { %97 = shalt.err (!%p94_p12)
}
  0x34   :  { %s98_s22 = scalar_lea.hbm %s149_s1, 256 }
  0x35   :  { %p99_p13 = scmp.ne.s32.totalorder %s149_s1, %s98_s22  ;;  %p102_p0 = scmp.lt.u32.totalorder %s98_s22, %s149_s1 }
  0x37   :  { %p104_p1 = pnand %p102_p0, %p99_p13 }
  0x39   :  { %107 = shalt.err (!%p104_p1)
}
  0x3a   :  { %48 = dma.vmem_to_hbm [thread:$0]  %s46_s19, 256, %s149_s1, [#allocation4]  }
  0x3b   :  { %110 = dma.done.wait [#allocation4], 256  }
  0x3c   :  { %111 = vsyncadd [#allocation4], 4294967040 }
  0x3d   :  { %52 = vsyncpa [#allocation3], 1 }
  0x3e   :  { %53 = vsyncpa [#allocation4], 1 }

</bundles_post_ra>
